<compile_context>
chip_gen: v7x
topology: tpu7x:2x2x1
jax: 0.10.0
libtpu: 0.0.40
codegen_flags: <defaults>
</compile_context>

<pallas_src>
import jax
import jax.numpy as jnp
from jax import lax
from jax.experimental import pallas as pl
from jax.experimental.pallas import tpu as pltpu


def _round_up(x, m):
    return ((x + m - 1) // m) * m


def _splade_head_kernel(h_ref, w_ref, b_ref, m_ref,
                        sw_ref, ew_ref, id_ref,
                        stash_ref):
    # h_ref:     (TM, H)      bf16 hidden rows (CLS already dropped), resident over axis 1
    # w_ref:     (H, TN)      bf16 MLM-head weight tile (only fetched during phase 1)
    # b_ref:     (nv, 1, TN)  f32 bias, VMEM-resident for the whole kernel
    # m_ref:     (TM, 1)      f32 attention mask rows
    # sw_ref:    (TM, TN)     sparse_weights output tile (out_dtype), written in phase 2
    # ew_ref:    (TM, 1)      f32 top-1 value   (doubles as the streaming max accumulator)
    # id_ref:    (TM, 1)      i32 top-1 index   (doubles as the streaming argmax accumulator)
    # stash_ref: (nv, TM, TN) out_dtype VMEM stash of the activation for this M tile
    p = pl.program_id(1)
    nv = pl.num_programs(1) // 2
    tm, tn = sw_ref.shape

    @pl.when(p < nv)
    def _phase1():
        v = p
        # bf16 x bf16 -> f32 on the MXU; bias add + epilogue in f32.
        logits = jnp.dot(h_ref[...], w_ref[...],
                         preferred_element_type=jnp.float32) + b_ref[v]
        # Module: torch.log(1 + torch.relu(logits)) * mask.
        full = jnp.log(1.0 + jnp.maximum(logits, 0.0)) * m_ref[...]
        # Quantize ONCE to the output dtype; max / argmax / threshold all use the
        # quantized values so the row maximum can never round below itself.
        full_q = full.astype(sw_ref.dtype)
        stash_ref[v] = full_q
        full_qf = full_q.astype(jnp.float32)

        tile_max = jnp.max(full_qf, axis=-1, keepdims=True)              # (TM, 1)
        col = lax.broadcasted_iota(jnp.int32, (tm, tn), 1) + v * tn
        sentinel = jnp.iinfo(jnp.int32).max
        tile_arg = jnp.min(jnp.where(full_qf == tile_max, col, sentinel),
                           axis=-1, keepdims=True)                       # (TM, 1)

        # ew_ref / id_ref blocks are resident across axis 1 -> use them directly
        # as the streaming top-1 accumulators (no extra scratch).
        @pl.when(v == 0)
        def _init():
            ew_ref[...] = tile_max
            id_ref[...] = tile_arg

        @pl.when(v > 0)
        def _update():
            better = tile_max > ew_ref[...]   # strict >: earlier tile wins ties
            id_ref[...] = jnp.where(better, tile_arg, id_ref[...])
            ew_ref[...] = jnp.where(better, tile_max, ew_ref[...])

    @pl.when(p >= nv)
    def _phase2():
        v = p - nv
        vals = stash_ref[v]                                              # (TM, TN)
        keep = vals.astype(jnp.float32) >= ew_ref[...]
        sw_ref[...] = jnp.where(keep, vals, jnp.zeros_like(vals))


def prepare_vocab_head(w_vocab, b_vocab, *, tn=2048):
    """One-time pad + bf16 cast of the MLM vocab head (hoisted out of the forward path).

    w_vocab: (H, V) f32   ->  (H, v_pad) bf16
    b_vocab: (V,)   f32   ->  (nv, 1, tn) f32  (VMEM-resident block inside the kernel)
    """
    H, V = w_vocab.shape
    tn = min(tn, _round_up(V, 128))
    assert tn % 128 == 0
    v_pad = _round_up(V, tn)
    nv = v_pad // tn
    w_p = jnp.zeros((H, v_pad), jnp.bfloat16).at[:, :V].set(
        w_vocab.astype(jnp.bfloat16))
    b_p = jnp.zeros((v_pad,), jnp.float32).at[:V].set(
        b_vocab.astype(jnp.float32)).reshape(nv, 1, tn)
    return w_p, b_p


def mtsplade_head(hidden, attention_mask, w_prep, b_prep, vocab_size, *,
                  topk=1, tm=512, out_dtype=jnp.bfloat16, w_buffers=None):
    """Mirrors MTSPLADEEncoder.forward (sparse_mode=False, topk=1).

    hidden:         (B, L+1, H) f32 backbone hidden states (incl. CLS)
    attention_mask: (B, L+1)    int/float mask
    w_prep, b_prep: outputs of prepare_vocab_head (padded bf16 weight, reshaped bias)
    vocab_size:     true V (unpadded)

    Tile knobs: tm (tokens), tn is baked into prepare_vocab_head. out_dtype controls the
    dtype of the dense sparse_weights output (bf16 halves its HBM stream). w_buffers=3
    optionally deepens the weight-tile pipeline (useful on v6e).
    """
    assert topk == 1, "only topk=1 (module default) is supported"
    B, Lp1, H = hidden.shape
    L = Lp1 - 1
    M = B * L
    nv, _one, tn = b_prep.shape
    v_pad = nv * tn
    V = vocab_size
    assert w_prep.shape == (H, v_pad) and w_prep.dtype == jnp.bfloat16
    assert V <= v_pad

    # Drop CLS (matches logits[:, 1:, :] / attention_mask[:, 1:]) and flatten tokens.
    h = hidden[:, 1:, :].reshape(M, H)
    am = attention_mask[:, 1:]
    mask = am.astype(jnp.float32).reshape(M, 1)

    # Token-axis tiling; keep >=2 M tiles when possible so the "parallel" axis can split
    # across the two TensorCores of a v7x chip.
    tm = min(tm, _round_up(M, 8))
    if M > 8 and (M + tm - 1) // tm < 2:
        tm = _round_up((M + 1) // 2, 8)
    assert tm % 8 == 0 and tn % 128 == 0
    m_pad = _round_up(M, tm)
    nm = m_pad // tm

    # Pad/cast the per-call activations only (weights were prepared once).
    h_p = jnp.zeros((m_pad, H), jnp.bfloat16).at[:M].set(h.astype(jnp.bfloat16))
    m_p = jnp.zeros((m_pad, 1), jnp.float32).at[:M].set(mask)

    # VMEM budget derived from the actual tile footprint (review: don't hardcode 48 MiB).
    isz = jnp.dtype(out_dtype).itemsize
    vmem_bytes = (nv * tm * tn * isz        # activation stash
                  + 2 * H * tn * 2          # W tile (double buffered, bf16)
                  + 2 * tm * H * 2          # hidden tile
                  + 2 * nv * tn * 4         # bias (resident)
                  + 2 * tm * tn * isz       # sparse_weights output tile
                  + 6 * tm * 16)            # mask / ew / id tiles
    vmem_limit = min(100 * 1024 * 1024,
                     max(32 * 1024 * 1024, int(vmem_bytes * 1.25) + (2 << 20)))

    w_spec_kwargs = {}
    if w_buffers is not None:               # e.g. 3 on v6e
        w_spec_kwargs["pipeline_mode"] = pl.Buffered(w_buffers)

    sw, ew, ids = pl.pallas_call(
        _splade_head_kernel,
        out_shape=(
            jax.ShapeDtypeStruct((M, V), out_dtype),     # sparse_weights (true shape)
            jax.ShapeDtypeStruct((M, 1), jnp.float32),   # expert_weights (top-1 value)
            jax.ShapeDtypeStruct((M, 1), jnp.int32),     # expert_ids    (top-1 index)
        ),
        grid_spec=pltpu.PrefetchScalarGridSpec(
            num_scalar_prefetch=0,
            grid=(nm, 2 * nv),               # M tiles outer (parallel), 2 phases x nv inner
            in_specs=[
                pl.BlockSpec((tm, H), lambda m, p: (m, 0)),               # hidden rows
                pl.BlockSpec((H, tn),                                     # W tile; no new
                             lambda m, p: (0, jnp.minimum(p, nv - 1)),    # DMA in phase 2
                             **w_spec_kwargs),
                pl.BlockSpec((nv, 1, tn), lambda m, p: (0, 0, 0)),        # bias, resident
                pl.BlockSpec((tm, 1), lambda m, p: (m, 0)),               # mask rows
            ],
            out_specs=[
                pl.BlockSpec((tm, tn), lambda m, p: (m, jnp.maximum(p - nv, 0))),
                pl.BlockSpec((tm, 1), lambda m, p: (m, 0)),
                pl.BlockSpec((tm, 1), lambda m, p: (m, 0)),
            ],
            scratch_shapes=[
                pltpu.VMEM((nv, tm, tn), out_dtype),     # activation stash for one M tile
            ],
        ),
        compiler_params=pltpu.CompilerParams(
            dimension_semantics=("parallel", "arbitrary"),
            vmem_limit_bytes=vmem_limit,
        ),
    )(h_p, w_prep, b_prep, m_p)

    return {
        "attention_mask": am,
        "expert_ids": ids.reshape(B, L, 1),       # (B, L, 1)
        "expert_weights": ew.reshape(B, L, 1),    # (B, L, 1)
        "sparse_weights": sw.reshape(B, L, V),    # (B, L, V) in out_dtype
    }


def _reference(hidden, attention_mask, w_vocab, b_vocab, out_dtype):
    """Pure-JAX reference with the same bf16-matmul / quantized-activation numerics."""
    h = hidden[:, 1:, :].astype(jnp.bfloat16)
    am = attention_mask[:, 1:].astype(jnp.float32)
    logits = jnp.einsum("blh,hv->blv", h, w_vocab.astype(jnp.bfloat16),
                        preferred_element_type=jnp.float32)
    logits = logits + b_vocab.astype(jnp.float32)
    full = jnp.log(1.0 + jnp.maximum(logits, 0.0)) * am[..., None]
    full_q = full.astype(out_dtype).astype(jnp.float32)
    ew = jnp.max(full_q, axis=-1, keepdims=True)
    ids = jnp.argmax(full_q, axis=-1, keepdims=True).astype(jnp.int32)
    sw = jnp.where(full_q >= ew, full_q, 0.0).astype(out_dtype)
    return am, ids, ew, sw


if __name__ == "__main__":
    # Small deterministic shapes; tm=8 / tn=128 exercise the multi-tile, two-phase grid,
    # M edge blocks (18 rows, tm=8) and V edge blocks (600 cols, tn=128, v_pad=640).
    B, Lp1, H, V, TOK_VOCAB = 2, 10, 32, 600, 64   # seq len after CLS drop = 9

    key = jax.random.PRNGKey(0)
    k_ids, k_emb, k_enc_w, k_enc_b, k_w, k_b = jax.random.split(key, 6)

    input_ids = jax.random.randint(k_ids, (B, Lp1), 0, TOK_VOCAB, dtype=jnp.int32)
    attention_mask = jnp.ones((B, Lp1), dtype=jnp.int32)
    attention_mask = attention_mask.at[1, -3:].set(0)   # pad tail of 2nd example

    # deterministic synthetic parameters
    emb_table = jax.random.normal(k_emb, (TOK_VOCAB, H), jnp.float32) * 0.5
    w_enc = jax.random.normal(k_enc_w, (H, H), jnp.float32) * 0.2
    b_enc = jax.random.normal(k_enc_b, (H,), jnp.float32) * 0.1
    w_vocab = jax.random.normal(k_w, (H, V), jnp.float32) * 0.3
    b_vocab = jax.random.normal(k_b, (V,), jnp.float32) * 0.1

    # TODO(synk): synthetic "transformer" hidden states stand in for the BERT backbone.
    hidden = jnp.tanh(emb_table[input_ids] @ w_enc + b_enc)     # (B, Lp1, H)

    # One-time weight prep, hoisted out of the forward path.
    w_prep, b_prep = prepare_vocab_head(w_vocab, b_vocab, tn=128)

    for out_dtype in (jnp.bfloat16, jnp.float32):
        out = mtsplade_head(hidden, attention_mask, w_prep, b_prep, V,
                            topk=1, tm=8, out_dtype=out_dtype)
        jax.block_until_ready(out)

        ref_am, ref_ids, ref_ew, ref_sw = _reference(
            hidden, attention_mask, w_vocab, b_vocab, out_dtype)
        assert out["sparse_weights"].dtype == out_dtype
        assert out["sparse_weights"].shape == (B, Lp1 - 1, V)
        assert jnp.array_equal(out["attention_mask"].astype(jnp.float32), ref_am)
        assert jnp.allclose(out["expert_weights"], ref_ew, rtol=1e-2, atol=1e-4)
        assert jnp.array_equal(out["expert_ids"], ref_ids)
        assert jnp.allclose(out["sparse_weights"].astype(jnp.float32),
                            ref_sw.astype(jnp.float32), rtol=1e-2, atol=1e-4)

    print("KERNEL_OK")
</pallas_src>

<mosaic_0001>
module attributes {stable_mosaic.version = 11 : i64} {
  func.func @_splade_head_kernel(%arg0: i32, %arg1: i32, %arg2: memref<8x32xbf16, #tpu.memory_space<vmem>>, %arg3: memref<32x128xbf16, #tpu.memory_space<vmem>>, %arg4: memref<5x1x128xf32, #tpu.memory_space<vmem>>, %arg5: memref<8x1xf32, #tpu.memory_space<vmem>>, %arg6: memref<8x128xbf16, #tpu.memory_space<vmem>>, %arg7: memref<8x1xf32, #tpu.memory_space<vmem>>, %arg8: memref<8x1xi32, #tpu.memory_space<vmem>>, %arg9: memref<5x8x128xbf16, #tpu.memory_space<vmem>>) attributes {dimension_semantics = [#tpu.dimension_semantics<parallel>, #tpu.dimension_semantics<arbitrary>], iteration_bounds = array<i64: 3, 10>, scalar_prefetch = 0 : i64, scratch_operands = 1 : i64, tpu.core_type = #tpu.core_type<tc>, window_params = [{transform_indices = @transform_0, window_bounds = array<i64: 8, 32>}, {transform_indices = @transform_1, window_bounds = array<i64: 32, 128>}, {pipeline_mode = #tpu.pipeline_mode<synchronous>, transform_indices = @transform_2, window_bounds = array<i64: 5, 1, 128>}, {transform_indices = @transform_3, window_bounds = array<i64: 8, 1>}, {transform_indices = @transform_4, window_bounds = array<i64: 8, 128>}, {transform_indices = @transform_5, window_bounds = array<i64: 8, 1>}, {transform_indices = @transform_6, window_bounds = array<i64: 8, 1>}]} {
    %c5_i32 = arith.constant 5 : i32
    %0 = arith.cmpi slt, %arg1, %c5_i32 : i32
    %1 = arith.extui %0 : i1 to i32
    %c0_i32 = arith.constant 0 : i32
    %2 = arith.cmpi ne, %1, %c0_i32 : i32
    scf.if %2 {
      %c0 = arith.constant 0 : index
      %c0_2 = arith.constant 0 : index
      %6 = vector.load %arg2[%c0, %c0_2] : memref<8x32xbf16, #tpu.memory_space<vmem>>, vector<8x32xbf16>
      %c0_3 = arith.constant 0 : index
      %c0_4 = arith.constant 0 : index
      %7 = vector.load %arg3[%c0_3, %c0_4] : memref<32x128xbf16, #tpu.memory_space<vmem>>, vector<32x128xbf16>
      %cst = arith.constant dense<0.000000e+00> : vector<8x128xf32>
      %8 = tpu.matmul %6, %7, %cst {dimension_numbers = #tpu.dot_dimension_numbers<[1], [0], [0], [1], [0, 0, 1, 1], [], []>} : vector<8x32xbf16>, vector<32x128xbf16>, vector<8x128xf32> -> vector<8x128xf32>
      %9 = arith.index_cast %arg1 : i32 to index
      %c0_5 = arith.constant 0 : index
      %c0_6 = arith.constant 0 : index
      %10 = vector.load %arg4[%9, %c0_5, %c0_6] : memref<5x1x128xf32, #tpu.memory_space<vmem>>, vector<1x1x128xf32>
      %11 = vector.shape_cast %10 : vector<1x1x128xf32> to vector<1x128xf32>
      %12 = vector.broadcast %11 : vector<1x128xf32> to vector<8x128xf32>
      %13 = arith.addf %8, %12 : vector<8x128xf32>
      %cst_7 = arith.constant 0.000000e+00 : f32
      %14 = vector.broadcast %cst_7 : f32 to vector<8x128xf32>
      %15 = arith.maximumf %13, %14 : vector<8x128xf32>
      %cst_8 = arith.constant 1.000000e+00 : f32
      %16 = vector.broadcast %cst_8 : f32 to vector<8x128xf32>
      %17 = arith.addf %16, %15 : vector<8x128xf32>
      %18 = math.log %17 : vector<8x128xf32>
      %c0_9 = arith.constant 0 : index
      %c0_10 = arith.constant 0 : index
      %19 = vector.load %arg5[%c0_9, %c0_10] : memref<8x1xf32, #tpu.memory_space<vmem>>, vector<8x1xf32>
      %20 = vector.broadcast %19 : vector<8x1xf32> to vector<8x128xf32>
      %21 = arith.mulf %18, %20 : vector<8x128xf32>
      %22 = arith.truncf %21 : vector<8x128xf32> to vector<8x128xbf16>
      %23 = arith.index_cast %arg1 : i32 to index
      %c0_11 = arith.constant 0 : index
      %c0_12 = arith.constant 0 : index
      %24 = vector.load %arg9[%23, %c0_11, %c0_12] : memref<5x8x128xbf16, #tpu.memory_space<vmem>>, vector<1x8x128xbf16>
      %25 = vector.shape_cast %24 : vector<1x8x128xbf16> to vector<8x128xbf16>
      %26 = vector.shape_cast %22 : vector<8x128xbf16> to vector<1x8x128xbf16>
      tpu.vector_store %arg9[%23, %c0_11, %c0_12], %26 {strides = array<i32>} : memref<5x8x128xbf16, #tpu.memory_space<vmem>>, vector<1x8x128xbf16>,
      %27 = arith.extf %22 : vector<8x128xbf16> to vector<8x128xf32>
      %cst_13 = arith.constant dense<0xFF800000> : vector<8xf32>
      %28 = vector.multi_reduction <maximumf>, %27, %cst_13 [1] : vector<8x128xf32> to vector<8xf32>
      %29 = vector.shape_cast %28 : vector<8xf32> to vector<8x1xf32>
      %30 = tpu.iota {dimensions = array<i32: 1>} : vector<8x128xi32>
      %c128_i32 = arith.constant 128 : i32
      %31 = arith.muli %arg1, %c128_i32 : i32
      %32 = vector.broadcast %31 : i32 to vector<8x128xi32>
      %33 = arith.addi %30, %32 : vector<8x128xi32>
      %34 = vector.broadcast %29 : vector<8x1xf32> to vector<8x128xf32>
      %35 = arith.cmpf oeq, %27, %34 : vector<8x128xf32>
      %c2147483647_i32 = arith.constant 2147483647 : i32
      %36 = vector.broadcast %c2147483647_i32 : i32 to vector<8x128xi32>
      %37 = arith.select %35, %33, %36 : vector<8x128xi1>, vector<8x128xi32>
      %cst_14 = arith.constant dense<2147483647> : vector<8xi32>
      %38 = vector.multi_reduction <minsi>, %37, %cst_14 [1] : vector<8x128xi32> to vector<8xi32>
      %39 = vector.shape_cast %38 : vector<8xi32> to vector<8x1xi32>
      %c0_i32_15 = arith.constant 0 : i32
      %40 = arith.cmpi eq, %arg1, %c0_i32_15 : i32
      %41 = arith.extui %40 : i1 to i32
      %c0_i32_16 = arith.constant 0 : i32
      %42 = arith.cmpi ne, %41, %c0_i32_16 : i32
      scf.if %42 {
        %c0_19 = arith.constant 0 : index
        %c0_20 = arith.constant 0 : index
        %46 = vector.load %arg7[%c0_19, %c0_20] : memref<8x1xf32, #tpu.memory_space<vmem>>, vector<8x1xf32>
        tpu.vector_store %arg7[%c0_19, %c0_20], %29 {strides = array<i32>} : memref<8x1xf32, #tpu.memory_space<vmem>>, vector<8x1xf32>,
        %c0_21 = arith.constant 0 : index
        %c0_22 = arith.constant 0 : index
        %47 = vector.load %arg8[%c0_21, %c0_22] : memref<8x1xi32, #tpu.memory_space<vmem>>, vector<8x1xi32>
        tpu.vector_store %arg8[%c0_21, %c0_22], %39 {strides = array<i32>} : memref<8x1xi32, #tpu.memory_space<vmem>>, vector<8x1xi32>,
      } else {
      }
      %c0_i32_17 = arith.constant 0 : i32
      %43 = arith.cmpi sgt, %arg1, %c0_i32_17 : i32
      %44 = arith.extui %43 : i1 to i32
      %c0_i32_18 = arith.constant 0 : i32
      %45 = arith.cmpi ne, %44, %c0_i32_18 : i32
      scf.if %45 {
        %c0_19 = arith.constant 0 : index
        %c0_20 = arith.constant 0 : index
        %46 = vector.load %arg7[%c0_19, %c0_20] : memref<8x1xf32, #tpu.memory_space<vmem>>, vector<8x1xf32>
        %47 = arith.cmpf ogt, %29, %46 : vector<8x1xf32>
        %c0_21 = arith.constant 0 : index
        %c0_22 = arith.constant 0 : index
        %48 = vector.load %arg8[%c0_21, %c0_22] : memref<8x1xi32, #tpu.memory_space<vmem>>, vector<8x1xi32>
        %49 = arith.select %47, %39, %48 : vector<8x1xi1>, vector<8x1xi32>
        %c0_23 = arith.constant 0 : index
        %c0_24 = arith.constant 0 : index
        %50 = vector.load %arg8[%c0_23, %c0_24] : memref<8x1xi32, #tpu.memory_space<vmem>>, vector<8x1xi32>
        tpu.vector_store %arg8[%c0_23, %c0_24], %49 {strides = array<i32>} : memref<8x1xi32, #tpu.memory_space<vmem>>, vector<8x1xi32>,
        %c0_25 = arith.constant 0 : index
        %c0_26 = arith.constant 0 : index
        %51 = vector.load %arg7[%c0_25, %c0_26] : memref<8x1xf32, #tpu.memory_space<vmem>>, vector<8x1xf32>
        %52 = arith.select %47, %29, %51 : vector<8x1xi1>, vector<8x1xf32>
        %c0_27 = arith.constant 0 : index
        %c0_28 = arith.constant 0 : index
        %53 = vector.load %arg7[%c0_27, %c0_28] : memref<8x1xf32, #tpu.memory_space<vmem>>, vector<8x1xf32>
        tpu.vector_store %arg7[%c0_27, %c0_28], %52 {strides = array<i32>} : memref<8x1xf32, #tpu.memory_space<vmem>>, vector<8x1xf32>,
      } else {
      }
    } else {
    }
    %c5_i32_0 = arith.constant 5 : i32
    %3 = arith.cmpi sge, %arg1, %c5_i32_0 : i32
    %4 = arith.extui %3 : i1 to i32
    %c0_i32_1 = arith.constant 0 : i32
    %5 = arith.cmpi ne, %4, %c0_i32_1 : i32
    scf.if %5 {
      %c5_i32_2 = arith.constant 5 : i32
      %6 = arith.subi %arg1, %c5_i32_2 : i32
      %7 = arith.index_cast %6 : i32 to index
      %c0 = arith.constant 0 : index
      %c0_3 = arith.constant 0 : index
      %8 = vector.load %arg9[%7, %c0, %c0_3] : memref<5x8x128xbf16, #tpu.memory_space<vmem>>, vector<1x8x128xbf16>
      %9 = vector.shape_cast %8 : vector<1x8x128xbf16> to vector<8x128xbf16>
      %10 = arith.extf %9 : vector<8x128xbf16> to vector<8x128xf32>
      %c0_4 = arith.constant 0 : index
      %c0_5 = arith.constant 0 : index
      %11 = vector.load %arg7[%c0_4, %c0_5] : memref<8x1xf32, #tpu.memory_space<vmem>>, vector<8x1xf32>
      %12 = vector.broadcast %11 : vector<8x1xf32> to vector<8x128xf32>
      %13 = arith.cmpf oge, %10, %12 : vector<8x128xf32>
      %cst = arith.constant 0.000000e+00 : bf16
      %14 = vector.broadcast %cst : bf16 to vector<8x128xbf16>
      %15 = arith.select %13, %9, %14 : vector<8x128xi1>, vector<8x128xbf16>
      %c0_6 = arith.constant 0 : index
      %c0_7 = arith.constant 0 : index
      %16 = vector.load %arg6[%c0_6, %c0_7] : memref<8x128xbf16, #tpu.memory_space<vmem>>, vector<8x128xbf16>
      tpu.vector_store %arg6[%c0_6, %c0_7], %15 {strides = array<i32>} : memref<8x128xbf16, #tpu.memory_space<vmem>>, vector<8x128xbf16>,
    } else {
    }
    return
  }
  func.func @transform_0(%arg0: i32, %arg1: i32) -> (i32, i32) {
    %c0_i32 = arith.constant 0 : i32
    %c0_i32_0 = arith.constant 0 : i32
    return %arg0, %c0_i32 : i32, i32
  }
  func.func @transform_1(%arg0: i32, %arg1: i32) -> (i32, i32) {
    %c4_i32 = arith.constant 4 : i32
    %0 = arith.minsi %arg1, %c4_i32 : i32
    %c0_i32 = arith.constant 0 : i32
    %c0_i32_0 = arith.constant 0 : i32
    return %c0_i32, %0 : i32, i32
  }
  func.func @transform_2(%arg0: i32, %arg1: i32) -> (i32, i32, i32) {
    %c0_i32 = arith.constant 0 : i32
    %c0_i32_0 = arith.constant 0 : i32
    %c0_i32_1 = arith.constant 0 : i32
    %c0_i32_2 = arith.constant 0 : i32
    return %c0_i32, %c0_i32_0, %c0_i32_1 : i32, i32, i32
  }
  func.func @transform_3(%arg0: i32, %arg1: i32) -> (i32, i32) {
    %c0_i32 = arith.constant 0 : i32
    %c0_i32_0 = arith.constant 0 : i32
    return %arg0, %c0_i32 : i32, i32
  }
  func.func @transform_4(%arg0: i32, %arg1: i32) -> (i32, i32) {
    %c5_i32 = arith.constant 5 : i32
    %0 = arith.subi %arg1, %c5_i32 : i32
    %c0_i32 = arith.constant 0 : i32
    %1 = arith.maxsi %0, %c0_i32 : i32
    %c0_i32_0 = arith.constant 0 : i32
    return %arg0, %1 : i32, i32
  }
  func.func @transform_5(%arg0: i32, %arg1: i32) -> (i32, i32) {
    %c0_i32 = arith.constant 0 : i32
    %c0_i32_0 = arith.constant 0 : i32
    return %arg0, %c0_i32 : i32, i32
  }
  func.func @transform_6(%arg0: i32, %arg1: i32) -> (i32, i32) {
    %c0_i32 = arith.constant 0 : i32
    %c0_i32_0 = arith.constant 0 : i32
    return %arg0, %c0_i32 : i32, i32
  }
}

</mosaic_0001>

<bundles_post_ra>
// kernel: tpu_custom_call.1
= control target key start
LH: loop header
LB: loop body
LE: loop exit
PB: predicated region body
PF: predicated region fallthrough
CT: control target
= control target key end

     0   :  { %s1332_s0 = inlined_call_operand.vmem [shape: bf16[24,32], index: 0, kind: input, shape index: {}]   ;;  %s1333_s1 = inlined_call_operand.hbm [shape: bf16[32,640], index: 1, kind: input, shape index: {}]   ;;  %s1334_s2 = inlined_call_operand.vmem [shape: f32[5,1,128], index: 2, kind: input, shape index: {}]   ;;  %s1335_s3 = inlined_call_operand.vmem [shape: f32[24,1], index: 3, kind: input, shape index: {}]   ;;  %s1336_s4 = inlined_call_operand.hbm [shape: bf16[18,600], index: 4, kind: output, shape index: {0}]   ;;  %s1337_s5 = inlined_call_operand.vmem [shape: f32[18,1], index: 5, kind: output, shape index: {1}]   ;;  %s1338_s6 = inlined_call_operand.vmem [shape: s32[18,1], index: 6, kind: output, shape index: {2}]  }
   0x1   :  { %1348 = sst [smem:[#allocation18_spill]] %s1333_s1 }
   0x2   :  { %12 = vsyncpa [#allocation4], 0 }
   0x3   :  { %14 = vsyncpa [#allocation4 + $0x1], 0 }
   0x4   :  { %15 = vsyncpa [#allocation5], 0 }
   0x5   :  { %17 = vsyncpa [#allocation5 + $0x1], 0  ;;  %s1057_s21 = smov 0   ;;  %s1059_s22 = smov 0  }
   0x6   :  { %s1061_s23 = smov 0   ;;  %s1063_s24 = smov 0  }
   0x7   :  { %s1065_s25 = smov 0   ;;  %s1067_s26 = smov 0  }
   0x8   :  { %s1069_s27 = smov 0   ;;  %s1071_s28 = smov 0  }
   0x9   :  { %s1073_s29 = smov 0   ;;  %s1075_s30 = smov 0  }
   0xa   :  { %s1077_s7 = smov 0  }
   0xb LB: > { %1349 = sst [smem:[#allocation9_spill]] %s979_s23  ;;  %s700_s8 = sadd.s32 4294967295, %s1011_s7   ;;  %s1011_s7 = sphi %s1077_s7, %s23_s7   ;;  %s1007_s30 = sphi %s1075_s30, %s1377_s30   ;;  %s1003_s29 = sphi %s1073_s29, %s1376_s29   ;;  %s999_s28 = sphi %s1071_s28, %s1375_s28   ;;  %s995_s27 = sphi %s1069_s27, %s1374_s27   ;;  %s991_s26 = sphi %s1067_s26, %s1373_s26   ;;  %s987_s25 = sphi %s1065_s25, %s1372_s25   ;;  %s983_s24 = sphi %s1063_s24, %s1371_s24   ;;  %s979_s23 = sphi %s1061_s23, %s1370_s23   ;;  %s975_s22 = sphi %s1059_s22, %s1379_s22   ;;  %s971_s21 = sphi %s1057_s21, %s1378_s21  }
   0xc   : > { %1350 = sst [smem:[#allocation10_spill]] %s987_s25  ;;  %s32_s10 = sadd.s32 1, %s1003_s29 }
   0xd   : > { %1351 = sst [smem:[#allocation11_spill]] %s991_s26  ;;  %s35_s11 = sadd.s32 1, %s1007_s30 }
   0xe   : > { %1352 = sst [smem:[#allocation12_spill]] %s1003_s29  ;;  %p33_p0 = scmp.ge.s32.totalorder %s32_s10, 10 }
   0xf   : > { %1353 = sst [smem:[#allocation13_spill]] %s1007_s30  ;;  %p65_p1 = scmp.lt.s32.totalorder %s1003_s29, 4 }
  0x10   : > { %s72_s12 = sadd.s32 1, %s991_s26  ;;  %p79_p2 = scmp.ne.s32.totalorder %s991_s26, %s987_s25 }
  0x11   : > { %s1381_s10 = smov (%p33_p0, %s32_s10), 0  ;;  %s1383_s11 = smov (!%p33_p0, %s35_s11), %s1007_s30 }
  0x12   : > { %1354 = sst [smem:[#allocation14_spill]] %s1381_s10  ;;  %p37_p3 = scmp.ge.s32.totalorder %s1383_s11, 3 }
  0x13   : > { %s1124_s13 = scalar_select %p65_p1, %s1003_s29, 4 }
  0x14   : > { %p67_p4 = scmp.lt.s32.totalorder %s1381_s10, 4  ;;  %p80_p5 = scmp.eq.s32.totalorder %s1011_s7, 0 }
  0x15   : > { %p85_p6 = scmp.ne.s32.totalorder %s987_s25, %s983_s24  ;;  %s1385_s11 = smov (%p37_p3, %s1383_s11), 0 }
  0x16   : > { %1355 = sst [smem:[#allocation15_spill]] %s1385_s11  ;;  %p1133_p7 = por %p80_p5, %p79_p2 }
  0x17   : > { %s68_s14 = scalar_select %p67_p4, %s1381_s10, 4 }
  0x18   : > { %p86_p8 = scmp.eq.s32.totalorder %s700_s8, 0  ;;  %s702_s17 = sadd.s32 4294967291, %s1003_s29 }
  0x19   : > { %s69_s16 = ssub.s32 %s1124_s13, %s68_s14  ;;  %p143_p11 = scmp.gt.s32.totalorder %s702_s17, 0 }
  0x1a   : > { %p70_p9 = scmp.eq.s32.totalorder %s69_s16, 0  ;;  %p1141_p10 = por %p86_p8, %p85_p6 }
  0x1b   : > { %s703_s19 = sadd.s32 4294967291, %s1381_s10  ;;  %s1387_s17 = smov (!%p143_p11, %s702_s17), 0 }
  0x1c   : > { %s1147_s20 = scalar_select %p70_p9, %s991_s26, %s72_s12  }
  0x1d   : > { %p146_p12 = scmp.gt.s32.totalorder %s703_s19, 0  ;;  %s148_s24 = ssub.s32 %s1007_s30, %s1385_s11 }
  0x1e   : > { %1358 = sst [smem:[#allocation16_spill]] %s1147_s20  ;;  %s153_s9 = sadd.s32 1, %s979_s23 }
  0x1f   : > { %p163_p13 = scmp.ne.s32.totalorder %s979_s23, %s975_s22  ;;  %s1389_s19 = smov (!%p146_p12, %s703_s19), 0 }
  0x20   : > { %p164_p0 = scmp.eq.s32.totalorder %s700_s8, 29  ;;  %p169_p1 = scmp.ne.s32.totalorder %s975_s22, %s971_s21 }
  0x21   : > { %s149_s14 = ssub.s32 %s1387_s17, %s1389_s19  ;;  %s1359_s16 = sadd.s32 4294967294, %s1011_s7  }
  0x22   : > { %p170_p2 = scmp.eq.s32.totalorder %s1359_s16, 29  ;;  %s150_s10 = sor.u32 %s149_s14, %s148_s24 }
  0x23   : > { %p1160_p3 = por %p164_p0, %p163_p13  ;;  %p151_p4 = scmp.eq.s32.totalorder %s150_s10, 0 }
  0x24   : > { %p1164_p5 = por %p170_p2, %p169_p1  ;;  %p756_p6 = scmp.lt.s32.totalorder %s1011_s7, 30 }
  0x25   : > { %s1360_s12 = scalar_select %p1160_p3, 1, 0 }
  0x26   : > { %s1361_s29 = scalar_select %p1164_p5, 1, 0 }
  0x27   : > { %s1170_s11 = scalar_select %p151_p4, %s979_s23, %s153_s9  }
  0x28   : > { %s252_s8 = sand.u32 1, %s991_s26   ;;  %s707_s30 = sshll.u32 %s1124_s13, 6 }
  0x29   : > { %1362 = sst [smem:[#allocation17_spill]] %s1170_s11  ;;  %s706_s20 = sshll.u32 %s252_s8, 4 }
  0x2a   : > { %s1363_s1 = sld [smem:[#allocation18_spill]]  ;;  %s256_s10 = scalar_lea.vmem [#allocation3], %s706_s20 }
  0x2b   : > { %s264_s24 = sshll.u32 %s256_s10, 4  ;;  %p1181_p8 = pnand %p756_p6, %p1133_p7  ;;  %s1185_s24 = int_to_ptr.vmem [resolvable:$true] %s264_s24 }
  0x2c   : > { %s1188_s9 = scalar_lea.sflag [#allocation4], %s252_s8 }
  0x2d   : > { %p861_p12 = pneg %p1181_p8 }
  0x30   : > { %s1177_s16 = scalar_lea.hbm %s1363_s1, %s707_s30  ;;  %s864_s20 = scalar_lea.hbm %s1363_s1, 1280 }
  0x31   : > { %s859_s30 = scalar_lea.hbm %s1177_s16, 256  ;;  %p865_p7 = scmp.lt.u32.totalorder %s1177_s16, %s1363_s1 }
  0x32   : > { %p860_p11 = scmp.ne.s32.totalorder %s1177_s16, %s859_s30  ;;  %p866_p1 = scmp.lt.u32.totalorder %s864_s20, %s859_s30 }
  0x33   : > { %p868_p4 = scmp.lt.u32.totalorder %s859_s30, %s1177_s16 }
  0x34   : > { %p862_p13 = pnand %p861_p12, %p860_p11  ;;  %p867_p2 = por %p866_p1, %p865_p7 }
  0x36   : > { %p863_p0 = pneg %p862_p13  ;;  %p869_p6 = por %p868_p4, %p867_p2 }
  0x38   : > { %p870_p9 = pnand %p869_p6, %p863_p0 }
  0x3a   : > { %873 = shalt.err (!%p870_p9)
}
  0x3b   : > { %s874_s8 = scalar_lea.vmem %s1185_s24, 256  ;;  %s1013_s10 = smov [#allocation3]  }
  0x3c   : > { %p875_p11 = scmp.ne.s32.totalorder %s1185_s24, %s874_s8  ;;  %s879_s13 = sshll.u32 %s1013_s10, 4  ;;  %s880_s13 = int_to_ptr.vmem [resolvable:$false] %s879_s13 }
  0x3d   : > { %s881_s15 = scalar_lea.vmem %s880_s13, 512  ;;  %p882_p3 = scmp.lt.s32.totalorder %s1185_s24, %s880_s13 }
  0x3e   : > { %p877_p13 = pnand %p875_p11, %p861_p12  ;;  %p883_p7 = scmp.lt.s32.totalorder %s881_s15, %s874_s8 }
  0x40   : > { %p878_p5 = pneg %p877_p13  ;;  %p884_p1 = por %p883_p7, %p882_p3 }
  0x42   : > { %p885_p2 = pnand %p884_p1, %p878_p5 }
  0x44   : > { %888 = shalt.err (!%p885_p2)
}
  0x45   : > { %s1014_s30 = smov 320   ;;  %s1015_s20 = smov 64  }
  0x46   : > { %s1016_s17 = smov 4   ;;  %p279_p9 = scmp.lt.s32.totalorder %s1011_s7, 31 }
  0x47   : > { %751 = dma.hbm_to_vmem [thread:$0]  (!%p1181_p8), %s1177_s16, 256, %s1185_s24, %s1188_s9, %s1014_s30, %s1015_s20, %s1016_s17  }
  0x48   : > { %p1365_p12 = scmp.ge.s32.totalorder %s1011_s7, 1 }
  0x4a   : > { %p280_p0 = pnand %p1365_p12, %p279_p9 }
  0x4b   : > { %s285_s19 = sand.u32 (!%p280_p0), 1, %s987_s25  }
  0x4c   : > { %283 = sbr.rel (%p280_p0) target bundleno = 944 (0x3b0), region = 36  ;;  %s709_s8 = sshll.u32 (!%p280_p0), %s285_s19, 4 }
  0x4d   : > { %s286_s10 = scalar_lea.sflag (!%p280_p0), [#allocation4], %s285_s19  ;;  %s289_s13 = scalar_lea.vmem (!%p280_p0), [#allocation3], %s709_s8 }
  0x53   : > { %962 = dma.done.wait (%p1141_p10), %s286_s10, 256  }
  0x54   : > { %964 = vsyncadd (%p1141_p10), %s286_s10, 4294967040  ;;  %s1346_s16 = sand.u32 1, %s975_s22   ;;  %p334_p3 = scmp.lt.s32.totalorder %s999_s28, 2 }
  0x55   : > { %s1228_s24 = sshll.u32 %s1346_s16, 2  ;;  %p715_p10 = scmp.ge.s32.totalorder %s995_s27, 5 }
  0x56   : > { %s335_s14 = scalar_select %p334_p3, %s999_s28, 2 }
  0x57   : > { %s321_s23 = scalar_lea.vmem [#allocation6], %s1228_s24  ;;  %359 = sbr.rel (%p715_p10) target bundleno = 781 (0x30d), region = 44  ;;  %v854_v0 = vld [vmem:[%s289_s13] sm:$0xff] (!%p715_p10)   ;;  %v1017_v1 = vmov (!%p715_p10), 0.0   ;;  %v855_v2 = vld [vmem:[%s289_s13 + $0x8] sm:$0xff] (!%p715_p10)   ;;  %vm1018_vm0 = vmmov (!%p715_p10), 0   ;;  %v447_v20 = vlaneseq (!%p715_p10) }
  0x58   : > { %s711_s9 = sshll.u32 %s335_s14, 2  ;;  %s712_s15 = sshll.u32 %s335_s14, 3  ;;  %735 = vmatprep.subr.bf16.mxu0 (!%p715_p10), %v1017_v1  ;;  %739 = vmatprep.mubr.msk.bf16.mxu0 (!%p715_p10), %vm1018_vm0, %v1017_v1  ;;  %v1019_v4 = vmov (!%p715_p10), 0   ;;  %vm385_vm1 = vcmask (!%p715_p10), 261120  }
  0x59   : > { %s337_s17 = scalar_lea.vmem %s1332_s0, %s711_s9  ;;  %s343_s8 = scalar_lea.vmem %s1335_s3, %s712_s15  ;;  %736 = vmatpush3.bf16.msra.mxu0 (!%p715_p10), %v854_v0  ;;  %853 = vset.pattern.permute.xlu0 (!%p715_p10), %v1019_v4  ;;  %v448_v21 = vand.u32 (!%p715_p10), 127, %v447_v20 }
  0x5a   : > { %s1240_s26 = scalar_lea.vmem %s1337_s5, %s712_s15  ;;  %s1245_s11 = scalar_lea.vmem %s1338_s6, %s712_s15  ;;  %v433_v3 = vld [vmem:[%s343_s8] sm:$0xff] (!%p715_p10)  ;;  %737 = vmatprep.subr.bf16.mxu0 (!%p715_p10), %v1017_v1 }
  0x5b   : > { %436 = vperm.xlu0 (!%p715_p10), %853, %v433_v3   ;;  %v360_v5 = vld [vmem:[%s337_s17] sm:$0xf] (!%p715_p10)  ;;  %s365_s16 = scalar_lea.vmem (!%p715_p10), %s1334_s2, %s995_s27  ;;  %s720_s13 = sshll.u32 (!%p715_p10), %s995_s27, 2 }
  0x5c   : > { %v716_v6 = vld [vmem:[%s365_s16] ss:$0 sm:$0xff] (!%p715_p10)  ;;  %s442_s14 = scalar_lea.vmem (!%p715_p10), [#allocation2], %s720_s13  ;;  %s721_s9 = sshll.u32 (!%p715_p10), %s995_s27, 7 }
  0x5d   : > { %738 = vmatpush3.bf16.msra.mxu0 (!%p715_p10), %v855_v2  ;;  %v450_v22 = vstv (!%p715_p10), %s721_s9  ;;  %p722_p5 = scmp.ne.s32.totalorder (!%p715_p10), %s995_s27, 0 }
  0x5e   : > { %v451_v23 = vadd.s32 %v450_v22, %v448_v21  ;;  %vm472_vm4 = vcmask (!%p722_p5), 7168  }
  0x60   : > { %740 = vmatmul.mubr.msk.bf16.vlgmr.msra.gmra.mrb[0].mxu0 %vm385_vm1, %v360_v5 }
  0xda   : > { %v437_v15 = vpop.permute.xlu0 %436 }
 0x133   : > { %v423_v7 = vpop.f32.mrb[0].mxu0 }
 0x134   : > { %v424_v8 = vadd.f32 %v716_v6, %v423_v7  ;;  %v741_v9 = vpop.f32.mrb[1].mxu0 }
 0x135   : > { %v426_v10 = vpop.f32.mrb[2].mxu0 }
 0x136   : > { %v429_v11 = vmax.f32 %v424_v8, 0.0  ;;  %v742_v12 = vpop.f32.mrb[3].mxu0 }
 0x138   : > { %v430_v13 = vadd.f32 1.0, %v429_v11 }
 0x13a   : > { %856 = vlog2.f32 %v430_v13 }
 0x144   : > { %v857_v14 = vpop.eup %856 }
 0x145   : > { %v432_v16 = vmul.f32 0.6931472, %v857_v14 }
 0x147   : > { %v439_v17 = vmul.f32 %v437_v15, %v432_v16 }
 0x149   : > { %v440_v18 = vpack.c.bf16 %v439_v17, %v439_v17 }
 0x14b   : > { %443 = vst [vmem:[%s442_s14] sm:$0xf] %v440_v18  ;;  %v444_v19 = vunpack.c.l.bf16 %v440_v18 }
 0x14d   : > { %445 = vmax.xlane.f32.xlu0 %v444_v19 }
 0x1da   : > { %v446_v24 = vpop.xlane.xlu0 %445 }
 0x1db   : > { %vm452_vm2 = vcmp.eq.f32.partialorder %v444_v19, %v446_v24  ;;  %473 = vst.msk [vmem:[%s1240_s26] sm:$0xff] (!%p722_p5), %vm472_vm4, %v446_v24 }
 0x1dc   : > { %v453_v25 = vsel %vm452_vm2, %v451_v23, 2147483647 }
 0x1dd   : > { %v455_v26 = vshra.s32 %v453_v25, 16  ;;  %v454_v28 = vand.u32 65535, %v453_v25 }
 0x1df   : > { %v457_v27 = vcvt.s32.f32 %v455_v26  ;;  %v456_v30 = vcvt.s32.f32 %v454_v28 }
 0x1e1   : > { %458 = vmin.xlane.f32.xlu1 %v457_v27 }
 0x26e   : > { %v459_v29 = vpop.xlane.xlu1 %458 }
 0x26f   : > { %vm460_vm3 = vcmp.eq.f32.partialorder %v457_v27, %v459_v29  ;;  %v465_v32 = vcvt.f32.s32 %v459_v29 }
 0x270   : > { %v461_v31 = vsel %vm460_vm3, %v456_v30, inf }
 0x271   : > { %462 = vmin.xlane.f32.xlu1 %v461_v31  ;;  %v466_v34 = vshll.u32 %v465_v32, 16 }
 0x2fb   : > { %471 = sbr.rel (%p722_p5) target bundleno = 772 (0x304), region = 48 }
 0x2fe   : > { %v463_v33 = vpop.xlane.xlu1 %462 }
 0x2ff   : > { %v464_v35 = vcvt.f32.s32 %v463_v33 }
 0x301   : > { %v467_v36 = vadd.s32 %v466_v34, %v464_v35 }
 0x303   : > { %474 = vst.msk [vmem:[%s1245_s11] sm:$0xff] %vm472_vm4, %v467_v36 }
 0x304 PF: > { %p723_p8 = scmp.le.s32.totalorder %s995_s27, 0 }
 0x305   : > { %v479_v37 = vld [vmem:[%s1240_s26] sm:$0xff] (!%p723_p8)  ;;  %vm483_vm5 = vcmask (!%p723_p8), 7168  }
 0x306   : > { %478 = sbr.rel (%p723_p8) target bundleno = 781 (0x30d), region = 52  ;;  %vm480_vm6 = vcmp.gt.f32.partialorder (!%p723_p8), %v446_v24, %v479_v37 }
 0x307   : > { %v486_v40 = vsel (!%p723_p8), %vm480_vm6, %v446_v24, %v479_v37 }
 0x308   : > { %487 = vst.msk [vmem:[%s1240_s26] sm:$0xff] (!%p723_p8), %vm483_vm5, %v486_v40 }
 0x30a   : > { %v481_v38 = vld [vmem:[%s1245_s11] sm:$0xff] (!%p723_p8) }
 0x30b   : > { %v482_v39 = vsel (!%p723_p8), %vm480_vm6, %v467_v36, %v481_v38 }
 0x30c   : > { %484 = vst.msk [vmem:[%s1245_s11] sm:$0xff] (!%p723_p8), %vm483_vm5, %v482_v39 }
 0x30d PF: > { %p724_p4 = scmp.lt.s32.totalorder %s995_s27, 5 }
 0x30e   : > { %v1020_v42 = vmov (!%p724_p4), 0   ;;  %s725_s15 = sadd.s32 (!%p724_p4), 4294967291, %s995_s27 }
 0x30f   : > { %491 = sbr.rel (%p724_p4) target bundleno = 916 (0x394), region = 56  ;;  %v497_v41 = vld [vmem:[%s1240_s26] sm:$0xff] (!%p724_p4)  ;;  %858 = vset.pattern.permute.xlu0 (!%p724_p4), %v1020_v42  ;;  %s726_s30 = sshll.u32 (!%p724_p4), %s725_s15, 2 }
 0x310   : > { %500 = vperm.xlu0 (!%p724_p4), %858, %v497_v41   ;;  %s494_s20 = scalar_lea.vmem (!%p724_p4), [#allocation2], %s726_s30 }
 0x311   : > { %v495_v43 = vld [vmem:[%s494_s20] sm:$0xf] (!%p724_p4) }
 0x312   : > { %v496_v44 = vunpack.c.l.bf16 (!%p724_p4), %v495_v43 }
 0x38f   : > { %v501_v45 = vpop.permute.xlu0 %500 }
 0x390   : > { %vm503_vm7 = vcmp.ge.f32.partialorder %v496_v44, %v501_v45 }
 0x391   : > { %vm504_vm8 = vmpackc.low %vm503_vm7, %vm503_vm7 }
 0x392   : > { %v505_v46 = vsel %vm504_vm8, %v495_v43, 0 }
 0x393   : > { %506 = vst [vmem:[%s321_s23] sm:$0xf] %v505_v46 }
 0x394 PF: > { %s728_s26 = sadd.s32 4294967291, %s995_s27  ;;  %s743_s11 = smul.u32 5, %s999_s28 }
 0x395   : > { %p524_p6 = scmp.gt.s32.totalorder %s728_s26, 0  ;;  %s534_s17 = sshll.u32 %s321_s23, 4  ;;  %s1272_s17 = int_to_ptr.vmem [resolvable:$true] %s534_s17 }
 0x396   : > { %s1366_s25 = sand.u32 1, %s975_s22   ;;  %s889_s13 = scalar_lea.vmem %s1272_s17, 64 }
 0x397   : > { %s1391_s26 = smov (!%p524_p6, %s728_s26), 0  ;;  %s508_s16 = scalar_lea.sflag [#allocation5], %s1366_s25 }
 0x398   : > { %s530_s19 = sadd.s32 %s743_s11, %s1391_s26  ;;  %p890_p11 = scmp.ne.s32.totalorder %s1272_s17, %s889_s13 }
 0x399   : > { %s729_s18 = sshll.u32 %s530_s19, 6  ;;  %p1367_p13 = scmp.ne.s32.totalorder %s1360_s12, 0 }
 0x39a   : > { %s532_s1 = scalar_lea.hbm %s1336_s4, %s729_s18  ;;  %s1021_s23 = smov [#allocation6]  }
 0x39b   : > { %p891_p7 = pnand %p890_p11, %p1367_p13  ;;  %s893_s27 = sshll.u32 %s1021_s23, 4  ;;  %s894_s27 = int_to_ptr.vmem [resolvable:$false] %s893_s27 }
 0x39c   : > { %s895_s28 = scalar_lea.vmem %s894_s27, 128  ;;  %p896_p2 = scmp.lt.s32.totalorder %s1272_s17, %s894_s27 }
 0x39d   : > { %p892_p1 = pneg %p891_p7  ;;  %p897_p9 = scmp.lt.s32.totalorder %s895_s28, %s889_s13 }
 0x39f   : > { %p898_p12 = por %p897_p9, %p896_p2 }
 0x3a1   : > { %p899_p0 = pnand %p898_p12, %p892_p1 }
 0x3a3   : > { %902 = shalt.err (!%p899_p0)
}
 0x3a4   : > { %s903_s24 = scalar_lea.hbm %s532_s1, 64  ;;  %s907_s15 = scalar_lea.hbm %s1336_s4, 960 }
 0x3a5   : > { %p904_p3 = scmp.ne.s32.totalorder %s532_s1, %s903_s24  ;;  %p908_p8 = scmp.lt.u32.totalorder %s532_s1, %s1336_s4 }
 0x3a6   : > { %p909_p4 = scmp.lt.u32.totalorder %s907_s15, %s903_s24  ;;  %p911_p11 = scmp.lt.u32.totalorder %s903_s24, %s532_s1 }
 0x3a7   : > { %p905_p10 = pnand %p904_p3, %p1367_p13 }
 0x3a8   : > { %p910_p6 = por %p909_p4, %p908_p8 }
 0x3a9   : > { %p906_p5 = pneg %p905_p10 }
 0x3aa   : > { %p912_p7 = por %p911_p11, %p910_p6 }
 0x3ac   : > { %p913_p1 = pnand %p912_p7, %p906_p5 }
 0x3ae   : > { %916 = shalt.err (!%p913_p1)
}
 0x3af   : > { %746 = dma.vmem_to_hbm [thread:$0]  (%p1367_p13), %s1272_s17, 64, %s532_s1, %s508_s16  }
 0x3b0 PF: > { %p757_p2 = scmp.ge.s32.totalorder %s1011_s7, 2  ;;  %s552_s26 = sand.u32 1, %s971_s21  }
 0x3b1   : > { %p1368_p9 = scmp.ne.s32.totalorder %s1361_s29, 0  ;;  %s553_s11 = scalar_lea.sflag [#allocation5], %s552_s26 }
 0x3b3   : > { %p753_p12 = pnand %p757_p2, %p1368_p9 }
 0x3b5   : > { %966 = dma.done.wait (!%p753_p12), %s553_s11, 64  }
 0x3b6   : > { %968 = vsyncadd (!%p753_p12), %s553_s11, 4294967232  ;;  %s23_s7 = sadd.s32 1, %s1011_s7   ;;  %s1369_s19 = sld [smem:[#allocation9_spill]] }
 0x3b7   : > { %p20_p0 = scmp.ge.s32.totalorder %s23_s7, 32   ;;  %s1370_s23 = sld [smem:[#allocation17_spill]] }
 0x3b8   : > { %s1371_s24 = sld [smem:[#allocation10_spill]]  ;;  %s1372_s25 = sld [smem:[#allocation11_spill]] }
 0x3b9   : > { %s1373_s26 = sld [smem:[#allocation16_spill]]  ;;  %s1374_s27 = sld [smem:[#allocation12_spill]] }
 0x3ba   : > { %s1375_s28 = sld [smem:[#allocation13_spill]]  ;;  %s1376_s29 = sld [smem:[#allocation14_spill]] }
 0x3bb   : > { %s1377_s30 = sld [smem:[#allocation15_spill]]  ;;  %s1378_s21 = smov %s975_s22 }
 0x3bc   : > { %s1379_s22 = smov %s1369_s19  ;;  %22 = sbr.rel (!%p20_p0) target bundleno = 11 (0xb), region = 130 }
 0x3c3   :  { %572 = vsyncpa [#allocation4], 1 }
 0x3c4   :  { %574 = vsyncpa [#allocation4 + $0x1], 1 }
 0x3c5   :  { %575 = vsyncpa [#allocation5], 1 }
 0x3c6   :  { %577 = vsyncpa [#allocation5 + $0x1], 1 }

</bundles_post_ra>
